<compile_context>
chip_gen: v6e
topology: v6e:2x2x1
jax: 0.10.0
libtpu: 0.0.40
codegen_flags: <defaults>
</compile_context>

<pallas_src>
import jax
import jax.numpy as jnp
from jax.experimental import pallas as pl
from jax.experimental.pallas import tpu as pltpu


def _round_up(x, m):
    return ((x + m - 1) // m) * m


def _pooler_head_kernel(x_ref, wp_ref, bp_ref, wh_ref, bh_ref, out_ref, acc_ref):
    """One (row-tile i, K-tile k) step of Pooler(Linear+Tanh) -> dropout(id) -> head Linear.

    x_ref  : [TM, H]      f32 tile of flattened hidden states (cast to bf16 here)
    wp_ref : [H, TK]      bf16 pooler weight K-slice (stored [in, out])
    bp_ref : [1, TK]      f32 pooler bias K-slice
    wh_ref : [TK, C_pad]  bf16 head weight K-slice (zero-padded lanes)
    bh_ref : [1, C_pad]   f32 head bias (zero-padded lanes)
    out_ref: [TM, C_pad]  output tile (written on last K step)
    acc_ref: [TM, C_pad]  f32 VMEM accumulator scratch
    """
    k = pl.program_id(1)

    @pl.when(k == 0)
    def _():
        acc_ref[...] = jnp.zeros_like(acc_ref)

    # In-kernel bf16 cast: avoids a wrapper-side full HBM pass over x.
    x = x_ref[...].astype(wp_ref.dtype)

    # Pooler K-slice: tanh(x @ Wp[:, kblk] + bp[kblk]).
    # MXU matmul with f32 accumulation; bias add + tanh stay in f32
    # (v5e has no bf16 VPU/EUP; tanh lands in the EUP slot for free).
    pooled = jnp.dot(x, wp_ref[...], preferred_element_type=jnp.float32)
    pooled = jnp.tanh(pooled + bp_ref[...])

    # Dropout in eval mode is identity.
    # Head partial product over this K slice, accumulated in f32 scratch.
    acc_ref[...] += jnp.dot(pooled.astype(wh_ref.dtype), wh_ref[...],
                            preferred_element_type=jnp.float32)

    @pl.when(k == pl.num_programs(1) - 1)
    def _():
        out_ref[...] = (acc_ref[...] + bh_ref[...]).astype(out_ref.dtype)


def model_with_head_forward(last_hidden_state, wp, bp, wh, bh, *,
                            tm=None, tk=None,
                            compute_dtype=jnp.bfloat16,
                            out_dtype=jnp.float32):
    """last_hidden_state: [B, S, H]. Returns [B, S, C] in `out_dtype`.

    wp: [H, H], bp: [H], wh: [H, C], bh: [C]  (weights stored as [in, out]).
    """
    B, S, H = last_hidden_state.shape
    C = wh.shape[1]
    rows = B * S

    # Lane-dense head width so the output store is an unmasked vst.
    # TODO(synk): round to 256 on v6e/v7x when C > 128 (MXU is 256-wide in N).
    c_pad = _round_up(C, 128)

    # ---- Row tile: sized to the problem. No HBM-side row padding; Pallas
    # masks the ragged last block and rows are independent. ----
    if tm is None:
        if rows <= 128:
            tm = _round_up(max(rows, 1), 8)
        elif rows <= 1024:
            tm = 128          # >= 2 grid steps -> both v7x TensorCores get work
        elif rows <= 4096:
            tm = 256
        else:
            tm = 512
    num_i = pl.cdiv(rows, tm)

    # ---- K tile over the pooler-output columns (the reduction dim of the head
    # matmul). Single full-H step when the weights comfortably fit in VMEM,
    # otherwise multiples of 128 so resident weight VMEM scales as H*tk. ----
    weight_budget = 24 * 1024 * 1024
    if tk is None:
        full_weight_bytes = (H * H + H * c_pad) * 2        # bf16, single-buffered
        if full_weight_bytes <= weight_budget:
            tk = H
        else:
            per_col = (H + c_pad) * 2 * 2                   # bf16, double-buffered
            tk = max(128, (weight_budget // per_col) // 128 * 128)
            tk = min(tk, _round_up(H, 128))
    Hk = _round_up(H, tk)
    num_k = Hk // tk

    # Activations: reshape only (no cast, no pad) -> no extra HBM pass over x.
    x2d = last_hidden_state.reshape(rows, H)

    wp_c = wp.astype(compute_dtype)
    bp2d = bp.reshape(1, H).astype(jnp.float32)
    wh_c = wh.astype(compute_dtype)
    bh2d = bh.reshape(1, C).astype(jnp.float32)

    # Zero-pad the K dim of the weights if the K tiling is ragged (zero columns
    # give tanh(0)=0 pooled values hitting zero Wh rows -> contribute nothing),
    # and the head lanes out to c_pad.
    if Hk != H:
        wp_c = jnp.pad(wp_c, ((0, 0), (0, Hk - H)))
        bp2d = jnp.pad(bp2d, ((0, 0), (0, Hk - H)))
        wh_c = jnp.pad(wh_c, ((0, Hk - H), (0, 0)))
    if c_pad != C:
        wh_c = jnp.pad(wh_c, ((0, 0), (0, c_pad - C)))
        bh2d = jnp.pad(bh2d, ((0, 0), (0, c_pad - C)))

    def _wspec(shape, index_map):
        # Constant-index blocks (single K step): double buffering buys nothing,
        # so single-buffer to halve resident-weight VMEM (key on v7x, 64 MiB).
        if num_k == 1:
            return pl.BlockSpec(shape, index_map, pipeline_mode=pl.Buffered(1))
        return pl.BlockSpec(shape, index_map)

    in_specs = [
        pl.BlockSpec((tm, H), lambda i, k: (i, 0)),     # x tile (re-fetched only when i changes)
        _wspec((H, tk), lambda i, k: (0, k)),           # pooler weight K-slice
        _wspec((1, tk), lambda i, k: (0, k)),           # pooler bias K-slice
        _wspec((tk, c_pad), lambda i, k: (k, 0)),       # head weight K-slice
        _wspec((1, c_pad), lambda i, k: (0, 0)),        # head bias
    ]
    out_specs = pl.BlockSpec((tm, c_pad), lambda i, k: (i, 0))

    # VMEM budget from the actual footprint (+margin), capped below the v7x
    # 64 MiB physical limit to leave compiler-internal headroom.
    x_bytes = jnp.dtype(last_hidden_state.dtype).itemsize
    o_bytes = jnp.dtype(out_dtype).itemsize
    wbuf = 1 if num_k == 1 else 2
    est = (2 * tm * H * x_bytes            # x tile, double-buffered
           + wbuf * H * tk * 2             # wp (bf16)
           + wbuf * tk * c_pad * 2         # wh (bf16)
           + wbuf * 8 * tk * 4             # bp (sublane-padded)
           + 8 * c_pad * 4                 # bh
           + 2 * tm * c_pad * o_bytes      # out tile, double-buffered
           + tm * c_pad * 4)               # f32 accumulator scratch
    vmem_limit = min(max(int(est * 1.25) + (4 << 20), 32 << 20), 56 << 20)

    out2d = pl.pallas_call(
        _pooler_head_kernel,
        out_shape=jax.ShapeDtypeStruct((rows, c_pad), out_dtype),
        grid_spec=pltpu.PrefetchScalarGridSpec(
            num_scalar_prefetch=0,
            grid=(num_i, num_k),                       # reduction axis last
            in_specs=in_specs,
            out_specs=out_specs,
            scratch_shapes=[pltpu.VMEM((tm, c_pad), jnp.float32)],
        ),
        compiler_params=pltpu.CompilerParams(
            dimension_semantics=("parallel", "arbitrary"),
            vmem_limit_bytes=vmem_limit,
        ),
    )(x2d, wp_c, bp2d, wh_c, bh2d)

    # Strip lane padding (no row padding to strip) and restore [B, S, C].
    out = out2d if c_pad == C else out2d[:, :C]
    return out.reshape(B, S, C)


def _reference(last_hidden_state, wp, bp, wh, bh):
    pooled = jnp.tanh(jnp.einsum("bsh,ho->bso", last_hidden_state, wp) + bp)
    return jnp.einsum("bsh,hc->bsc", pooled, wh) + bh


if __name__ == "__main__":
    # Small shapes consistent with the module: batch=2, seq=8, hidden=32, classes=16.
    B, S, H, C = 2, 8, 32, 16

    key = jax.random.PRNGKey(0)
    k_x, k_wp, k_bp, k_wh, k_bh = jax.random.split(key, 5)

    # Deterministic synthetic parameters (PyTorch-Linear-like scale), stored as [in, out].
    x = jax.random.normal(k_x, (B, S, H), dtype=jnp.float32)
    wp = jax.random.uniform(k_wp, (H, H), minval=-1.0, maxval=1.0, dtype=jnp.float32) / jnp.sqrt(H)
    bp = jax.random.uniform(k_bp, (H,), minval=-1.0, maxval=1.0, dtype=jnp.float32) / jnp.sqrt(H)
    wh = jax.random.uniform(k_wh, (H, C), minval=-1.0, maxval=1.0, dtype=jnp.float32) / jnp.sqrt(H)
    bh = jax.random.uniform(k_bh, (C,), minval=-1.0, maxval=1.0, dtype=jnp.float32) / jnp.sqrt(H)

    out = model_with_head_forward(x, wp, bp, wh, bh)
    out = jax.block_until_ready(out)

    ref = _reference(x, wp, bp, wh, bh)
    assert out.shape == (B, S, C)
    # bf16 matmul inputs (f32 accumulation) vs the pure-f32 reference -> loose tolerance.
    assert jnp.allclose(out, ref, atol=2e-2, rtol=2e-2), "mismatch vs reference"

    print("KERNEL_OK")
</pallas_src>

<mosaic_0001>
module attributes {stable_mosaic.version = 11 : i64} {
  func.func @_pooler_head_kernel(%arg0: i32, %arg1: i32, %arg2: memref<16x32xf32, #tpu.memory_space<vmem>>, %arg3: memref<32x32xbf16, #tpu.memory_space<vmem>>, %arg4: memref<1x32xf32, #tpu.memory_space<vmem>>, %arg5: memref<32x128xbf16, #tpu.memory_space<vmem>>, %arg6: memref<1x128xf32, #tpu.memory_space<vmem>>, %arg7: memref<16x128xf32, #tpu.memory_space<vmem>>, %arg8: memref<16x128xf32, #tpu.memory_space<vmem>>) attributes {dimension_semantics = [#tpu.dimension_semantics<parallel>, #tpu.dimension_semantics<arbitrary>], iteration_bounds = array<i64: 1, 1>, scalar_prefetch = 0 : i64, scratch_operands = 1 : i64, tpu.core_type = #tpu.core_type<tc>, window_params = [{transform_indices = @transform_0, window_bounds = array<i64: 16, 32>}, {pipeline_mode = #tpu.pipeline_mode<synchronous>, transform_indices = @transform_1, window_bounds = array<i64: 32, 32>}, {pipeline_mode = #tpu.pipeline_mode<synchronous>, transform_indices = @transform_2, window_bounds = array<i64: 1, 32>}, {pipeline_mode = #tpu.pipeline_mode<synchronous>, transform_indices = @transform_3, window_bounds = array<i64: 32, 128>}, {pipeline_mode = #tpu.pipeline_mode<synchronous>, transform_indices = @transform_4, window_bounds = array<i64: 1, 128>}, {transform_indices = @transform_5, window_bounds = array<i64: 16, 128>}]} {
    %c0_i32 = arith.constant 0 : i32
    %0 = arith.cmpi eq, %arg1, %c0_i32 : i32
    %1 = arith.extui %0 : i1 to i32
    %c0_i32_0 = arith.constant 0 : i32
    %2 = arith.cmpi ne, %1, %c0_i32_0 : i32
    scf.if %2 {
      %cst_15 = arith.constant 0.000000e+00 : f32
      %20 = vector.broadcast %cst_15 : f32 to vector<16x128xf32>
      %c0_16 = arith.constant 0 : index
      %c0_17 = arith.constant 0 : index
      %21 = vector.load %arg8[%c0_16, %c0_17] : memref<16x128xf32, #tpu.memory_space<vmem>>, vector<16x128xf32>
      tpu.vector_store %arg8[%c0_16, %c0_17], %20 {strides = array<i32>} : memref<16x128xf32, #tpu.memory_space<vmem>>, vector<16x128xf32>,
    } else {
    }
    %c0 = arith.constant 0 : index
    %c0_1 = arith.constant 0 : index
    %3 = vector.load %arg2[%c0, %c0_1] : memref<16x32xf32, #tpu.memory_space<vmem>>, vector<16x32xf32>
    %4 = arith.truncf %3 : vector<16x32xf32> to vector<16x32xbf16>
    %c0_2 = arith.constant 0 : index
    %c0_3 = arith.constant 0 : index
    %5 = vector.load %arg3[%c0_2, %c0_3] : memref<32x32xbf16, #tpu.memory_space<vmem>>, vector<32x32xbf16>
    %cst = arith.constant dense<0.000000e+00> : vector<16x32xf32>
    %6 = tpu.matmul %4, %5, %cst {dimension_numbers = #tpu.dot_dimension_numbers<[1], [0], [0], [1], [0, 0, 1, 1], [], []>} : vector<16x32xbf16>, vector<32x32xbf16>, vector<16x32xf32> -> vector<16x32xf32>
    %c0_4 = arith.constant 0 : index
    %c0_5 = arith.constant 0 : index
    %7 = vector.load %arg4[%c0_4, %c0_5] : memref<1x32xf32, #tpu.memory_space<vmem>>, vector<1x32xf32>
    %8 = vector.broadcast %7 : vector<1x32xf32> to vector<16x32xf32>
    %9 = arith.addf %6, %8 : vector<16x32xf32>
    %10 = math.tanh %9 : vector<16x32xf32>
    %c0_6 = arith.constant 0 : index
    %c0_7 = arith.constant 0 : index
    %11 = vector.load %arg8[%c0_6, %c0_7] : memref<16x128xf32, #tpu.memory_space<vmem>>, vector<16x128xf32>
    %12 = arith.truncf %10 : vector<16x32xf32> to vector<16x32xbf16>
    %c0_8 = arith.constant 0 : index
    %c0_9 = arith.constant 0 : index
    %13 = vector.load %arg5[%c0_8, %c0_9] : memref<32x128xbf16, #tpu.memory_space<vmem>>, vector<32x128xbf16>
    %cst_10 = arith.constant dense<0.000000e+00> : vector<16x128xf32>
    %14 = tpu.matmul %12, %13, %cst_10 {dimension_numbers = #tpu.dot_dimension_numbers<[1], [0], [0], [1], [0, 0, 1, 1], [], []>} : vector<16x32xbf16>, vector<32x128xbf16>, vector<16x128xf32> -> vector<16x128xf32>
    %15 = arith.addf %11, %14 : vector<16x128xf32>
    %c0_11 = arith.constant 0 : index
    %c0_12 = arith.constant 0 : index
    %16 = vector.load %arg8[%c0_11, %c0_12] : memref<16x128xf32, #tpu.memory_space<vmem>>, vector<16x128xf32>
    tpu.vector_store %arg8[%c0_11, %c0_12], %15 {strides = array<i32>} : memref<16x128xf32, #tpu.memory_space<vmem>>, vector<16x128xf32>,
    %c0_i32_13 = arith.constant 0 : i32
    %17 = arith.cmpi eq, %arg1, %c0_i32_13 : i32
    %18 = arith.extui %17 : i1 to i32
    %c0_i32_14 = arith.constant 0 : i32
    %19 = arith.cmpi ne, %18, %c0_i32_14 : i32
    scf.if %19 {
      %c0_15 = arith.constant 0 : index
      %c0_16 = arith.constant 0 : index
      %20 = vector.load %arg8[%c0_15, %c0_16] : memref<16x128xf32, #tpu.memory_space<vmem>>, vector<16x128xf32>
      %c0_17 = arith.constant 0 : index
      %c0_18 = arith.constant 0 : index
      %21 = vector.load %arg6[%c0_17, %c0_18] : memref<1x128xf32, #tpu.memory_space<vmem>>, vector<1x128xf32>
      %22 = vector.broadcast %21 : vector<1x128xf32> to vector<16x128xf32>
      %23 = arith.addf %20, %22 : vector<16x128xf32>
      %c0_19 = arith.constant 0 : index
      %c0_20 = arith.constant 0 : index
      %24 = vector.load %arg7[%c0_19, %c0_20] : memref<16x128xf32, #tpu.memory_space<vmem>>, vector<16x128xf32>
      tpu.vector_store %arg7[%c0_19, %c0_20], %23 {strides = array<i32>} : memref<16x128xf32, #tpu.memory_space<vmem>>, vector<16x128xf32>,
    } else {
    }
    return
  }
  func.func @transform_0(%arg0: i32, %arg1: i32) -> (i32, i32) {
    %c0_i32 = arith.constant 0 : i32
    %c0_i32_0 = arith.constant 0 : i32
    return %arg0, %c0_i32 : i32, i32
  }
  func.func @transform_1(%arg0: i32, %arg1: i32) -> (i32, i32) {
    %c0_i32 = arith.constant 0 : i32
    %c0_i32_0 = arith.constant 0 : i32
    return %c0_i32, %arg1 : i32, i32
  }
  func.func @transform_2(%arg0: i32, %arg1: i32) -> (i32, i32) {
    %c0_i32 = arith.constant 0 : i32
    %c0_i32_0 = arith.constant 0 : i32
    return %c0_i32, %arg1 : i32, i32
  }
  func.func @transform_3(%arg0: i32, %arg1: i32) -> (i32, i32) {
    %c0_i32 = arith.constant 0 : i32
    %c0_i32_0 = arith.constant 0 : i32
    return %arg1, %c0_i32 : i32, i32
  }
  func.func @transform_4(%arg0: i32, %arg1: i32) -> (i32, i32) {
    %c0_i32 = arith.constant 0 : i32
    %c0_i32_0 = arith.constant 0 : i32
    %c0_i32_1 = arith.constant 0 : i32
    return %c0_i32, %c0_i32_0 : i32, i32
  }
  func.func @transform_5(%arg0: i32, %arg1: i32) -> (i32, i32) {
    %c0_i32 = arith.constant 0 : i32
    %c0_i32_0 = arith.constant 0 : i32
    return %arg0, %c0_i32 : i32, i32
  }
}

</mosaic_0001>

<bundles_post_ra>
// kernel: tpu_custom_call.1
= control target key start
LH: loop header
LB: loop body
LE: loop exit
PB: predicated region body
PF: predicated region fallthrough
CT: control target
= control target key end

     0   :  { %10 = vsyncpa [#allocation4], 0  ;;  %s443_s0 = inlined_call_operand.hbm [shape: f32[16,32], index: 0, kind: input, shape index: {}]   ;;  %s444_s1 = inlined_call_operand.hbm [shape: bf16[32,32], index: 1, kind: input, shape index: {}]   ;;  %s445_s2 = inlined_call_operand.vmem [shape: f32[1,32], index: 2, kind: input, shape index: {}]   ;;  %s446_s3 = inlined_call_operand.hbm [shape: bf16[32,128], index: 3, kind: input, shape index: {}]   ;;  %s447_s4 = inlined_call_operand.vmem [shape: f32[1,128], index: 4, kind: input, shape index: {}]   ;;  %s448_s5 = inlined_call_operand.hbm [shape: f32[16,128], index: 5, kind: output, shape index: {}]  }
   0x1   :  { %11 = vsyncpa [#allocation7], 0 }
   0x2   :  { %12 = vsyncpa [#allocation5], 0  ;;  %s377_s18 = smov [#allocation6]  }
   0x3   :  { %s30_s19 = sshll.u32 %s377_s18, 4  ;;  %s31_s19 = int_to_ptr.vmem [resolvable:$true] %s30_s19 }
   0x4   :  { %s299_s20 = scalar_lea.vmem %s31_s19, 256  ;;  %p304_p1 = scmp.lt.s32.totalorder %s31_s19, %s31_s19 }
   0x5   :  { %p300_p0 = scmp.ne.s32.totalorder %s31_s19, %s299_s20  ;;  %p305_p2 = scmp.lt.s32.totalorder %s299_s20, %s299_s20 }
   0x7   :  { %p306_p3 = por %p305_p2, %p304_p1 }
   0x9   :  { %p307_p4 = pnand %p306_p3, %p300_p0 }
   0xb   :  { %310 = shalt.err (!%p307_p4)
}
   0xc   :  { %s378_s21 = smov 64   ;;  %s379_s22 = smov 4  }
   0xd   :  { %36 = dma.hbm_to_vmem [thread:$0]  %s444_s1, 256, %s31_s19, [#allocation7], %s378_s21, %s378_s21, %s379_s22  }
   0xe   :  { %s380_s25 = smov [#allocation3]  }
   0xf   :  { %s18_s26 = sshll.u32 %s380_s25, 4  ;;  %s19_s26 = int_to_ptr.vmem [resolvable:$true] %s18_s26 }
  0x10   :  { %s319_s27 = scalar_lea.vmem %s19_s26, 256  ;;  %p324_p6 = scmp.lt.s32.totalorder %s19_s26, %s19_s26 }
  0x11   :  { %p320_p5 = scmp.ne.s32.totalorder %s19_s26, %s319_s27  ;;  %p325_p7 = scmp.lt.s32.totalorder %s319_s27, %s319_s27 }
  0x13   :  { %p326_p8 = por %p325_p7, %p324_p6 }
  0x15   :  { %p327_p9 = pnand %p326_p8, %p320_p5 }
  0x17   :  { %330 = shalt.err (!%p327_p9)
}
  0x18   :  { %s381_s28 = smov 128   ;;  %s382_s29 = smov 8  }
  0x19   :  { %24 = dma.hbm_to_vmem [thread:$0]  %s443_s0, 256, %s19_s26, [#allocation4], %s381_s28, %s381_s28, %s382_s29  }
  0x1a   :  { %s383_s1 = smov [#allocation8]  }
  0x1b   :  { %s44_s7 = sshll.u32 %s383_s1, 4  ;;  %s45_s7 = int_to_ptr.vmem [resolvable:$true] %s44_s7 }
  0x1c   :  { %s339_s8 = scalar_lea.vmem %s45_s7, 256  ;;  %p344_p11 = scmp.lt.s32.totalorder %s45_s7, %s45_s7 }
  0x1d   :  { %p340_p10 = scmp.ne.s32.totalorder %s45_s7, %s339_s8  ;;  %p345_p12 = scmp.lt.s32.totalorder %s339_s8, %s339_s8 }
  0x1f   :  { %p346_p13 = por %p345_p12, %p344_p11 }
  0x21   :  { %p347_p0 = pnand %p346_p13, %p340_p10 }
  0x23   :  { %350 = shalt.err (!%p347_p0)
}
  0x24   :  { %50 = dma.hbm_to_vmem [thread:$0]  %s446_s3, 256, %s45_s7, [#allocation7], %s378_s21, %s378_s21, %s379_s22  }
  0x25   :  { %371 = dma.done.wait [#allocation4], 256  }
  0x26   :  { %372 = vsyncadd [#allocation4], 4294967040 }
  0x27   :  { %373 = dma.done.wait [#allocation7], 512  }
  0x28   :  { %374 = vsyncadd [#allocation7], 4294966784  ;;  %v384_v0 = vmov 0.0   ;;  %vm385_vm0 = vmmov 0   ;;  %v283_v1 = vld [vmem:[#allocation6 + $0x8] sm:$0xff]   ;;  %v284_v2 = vld [vmem:[#allocation6] sm:$0xff]  }
  0x29   :  { %257 = vmatprep.subr.bf16.mxu0 %v384_v0  ;;  %261 = vmatprep.mubr.msk.bf16.mxu0 %vm385_vm0, %v384_v0  ;;  %v69_v3 = vld [vmem:[#allocation3] sm:$0xff]  ;;  %v70_v4 = vld [vmem:[#allocation3 + $0x8] sm:$0xff]  ;;  %vm95_vm1 = vcmask 261120  }
  0x2a   :  { %265 = vmatprep.subr.bf16.mxu1 %v384_v0  ;;  %269 = vmatprep.mubr.msk.bf16.mxu1 %vm385_vm0, %v384_v0  ;;  %v71_v5 = vpack.c.bf16 %v70_v4, %v69_v3  ;;  %v285_v6 = vld [vmem:[#allocation8 + $0x8] sm:$0xff]   ;;  %v286_v7 = vld [vmem:[#allocation8] sm:$0xff]  }
  0x2b   :  { %258 = vmatpush3.bf16.msra.mxu0 %v283_v1  ;;  %266 = vmatpush3.bf16.msra.mxu1 %v285_v6  ;;  %v243_v8 = vld [vmem:[%s445_s2] ss:$0 sm:$0xff]  ;;  %s386_s2 = smov [#allocation9]  }
  0x2c   :  { %259 = vmatprep.subr.bf16.mxu0 %v384_v0  ;;  %267 = vmatprep.subr.bf16.mxu1 %v384_v0  ;;  %v250_v18 = vld [vmem:[%s447_s4] ss:$0 sm:$0xff]  ;;  %s230_s13 = sshll.u32 %s386_s2, 4  ;;  %s231_s13 = int_to_ptr.vmem [resolvable:$true] %s230_s13 }
  0x2d   :  { %s351_s14 = scalar_lea.vmem %s231_s13, 256  ;;  %p356_p2 = scmp.lt.s32.totalorder %s231_s13, %s231_s13 }
  0x2e   :  { %p352_p1 = scmp.ne.s32.totalorder %s231_s13, %s351_s14  ;;  %p357_p3 = scmp.lt.s32.totalorder %s351_s14, %s351_s14 }
  0x2f   :  { %260 = vmatpush3.bf16.msra.mxu0 %v284_v2  ;;  %268 = vmatpush3.bf16.msra.mxu1 %v286_v7 }
  0x30   :  { %p358_p4 = por %p357_p3, %p356_p2 }
  0x32   :  { %262 = vmatmul.mubr.msk.bf16.vlgmr.msra.gmra.mxu0 %vm95_vm1, %v71_v5  ;;  %p359_p5 = pnand %p358_p4, %p352_p1 }
  0xf2   :  { %v133_v9 = vpop.f32.mrf.mxu0 }
  0xf3   :  { %v134_v10 = vadd.f32 %v243_v8, %v133_v9 }
  0xf4   :  { %v263_v11 = vpop.f32.mrf.mxu0 }
  0xf5   :  { %287 = vtanh.f32 %v134_v10 }
  0xf6   :  { %v136_v12 = vpop.f32.mrf.mxu0 }
  0xf7   :  { %v137_v13 = vadd.f32 %v243_v8, %v136_v12 }
  0xf8   :  { %v264_v14 = vpop.f32.mrf.mxu0 }
  0xf9   :  { %289 = vtanh.f32 %v137_v13 }
 0x102   :  { %v288_v15 = vpop.eup %287 }
 0x106   :  { %v290_v16 = vpop.eup %289 }
 0x107   :  { %v144_v17 = vpack.c.bf16 %v290_v16, %v288_v15 }
 0x109   :  { %270 = vmatmul.mubr.msk.bf16.vlgmr.msra.gmra.mxu1 %vm95_vm1, %v144_v17 }
 0x1c9   :  { %v198_v19 = vpop.f32.mrf.mxu1 }
 0x1ca   :  { %v221_v20 = vadd.f32 %v250_v18, %v198_v19 }
 0x1cb   :  { %v271_v21 = vpop.f32.mrf.mxu1 }
 0x1cc   :  { %223 = vst [vmem:[#allocation9] sm:$0xff] %v221_v20 }
 0x1cd   :  { %v201_v22 = vpop.f32.mrf.mxu1 }
 0x1ce   :  { %v222_v23 = vadd.f32 %v250_v18, %v201_v22 }
 0x1cf   :  { %v272_v24 = vpop.f32.mrf.mxu1 }
 0x1d0   :  { %224 = vst [vmem:[#allocation9 + $0x8] sm:$0xff] %v222_v23 }
 0x1d1   :  { %362 = shalt.err (!%p359_p5)
}
 0x1d2   :  { %236 = dma.vmem_to_hbm [thread:$0]  %s231_s13, 256, %s448_s5, [#allocation5], %s381_s28, %s381_s28, %s382_s29  }
 0x1d3   :  { %375 = dma.done.wait [#allocation5], 256  }
 0x1d4   :  { %376 = vsyncadd [#allocation5], 4294967040 }
 0x1d5   :  { %240 = vsyncpa [#allocation4], 1 }
 0x1d6   :  { %241 = vsyncpa [#allocation7], 1 }
 0x1d7   :  { %242 = vsyncpa [#allocation5], 1 }

</bundles_post_ra>
